<compile_context>
chip_gen: v7x
topology: tpu7x:2x2x1
jax: 0.10.0
libtpu: 0.0.40
codegen_flags: <defaults>
</compile_context>

<pallas_src>
import functools

import jax
import jax.numpy as jnp
from jax.experimental import pallas as pl
from jax.experimental.pallas import tpu as pltpu


def _make_kernel(use_vpu_head: bool):
    def kernel(xs_ref, xa_ref, w1s_ref, w1a_ref, b1_ref, w2_ref, b2_ref,
               w3_ref, b3_ref, o_ref):
        # xs: (S, TB), xa: (A, TB) -- batch on the lane axis.
        # Layer 1: two accumulating dots replace the concat([states, actions]).
        h1 = jnp.dot(w1s_ref[...], xs_ref[...],
                     preferred_element_type=jnp.float32)
        h1 = h1 + jnp.dot(w1a_ref[...], xa_ref[...],
                          preferred_element_type=jnp.float32)
        h1 = jnp.maximum(h1 + b1_ref[...], 0.0)                 # f32 bias+ReLU

        # Layer 2 (cast the streaming operand back to the MXU compute dtype).
        h2 = jnp.dot(w2_ref[...], h1.astype(w2_ref.dtype),
                     preferred_element_type=jnp.float32) + b2_ref[...]
        h2 = jnp.maximum(h2, 0.0)

        # Layer 3 (Q head).
        if use_vpu_head:
            # (1, H2) @ (H2, TB) as broadcast-mul + sublane reduce: VPU/XLU
            # slots are otherwise idle, frees a third of the MXU pushes.
            q = jnp.sum(h2 * w3_ref[...], axis=0, keepdims=True) + b3_ref[...]
        else:
            q = jnp.dot(w3_ref[...], h2.astype(w3_ref.dtype),
                        preferred_element_type=jnp.float32) + b3_ref[...]
        o_ref[...] = q.astype(o_ref.dtype)                      # output act = 'none'

    return kernel


def _choose_batch_tile(B, block_batch):
    """Lane-multiple batch tile; >=4 grid steps once the batch allows it."""
    B128 = 128 * pl.cdiv(B, 128)
    tb_cap = max(128, 128 * (min(int(block_batch), 32768) // 128))
    TB = min(tb_cap, B128)
    if B128 >= 4 * 128:
        # v7x megacore: keep at least 4 grid steps so both TCs get work.
        TB = min(TB, max(128, 128 * (B128 // (4 * 128))))
    Bp = TB * pl.cdiv(B128, TB)
    return TB, Bp


@functools.partial(jax.jit, static_argnames=("block_batch", "compute_dtype"))
def contqnet_forward(states, actions, params, *, block_batch=16384,
                     compute_dtype=jnp.bfloat16):
    """states: (B, S), actions: (B, A). Returns Q: (B, 1)."""
    w1, b1, w2, b2, w3, b3 = params
    B, S = states.shape
    A = actions.shape[1]
    H1, H2, O = w1.shape[0], w2.shape[0], w3.shape[0]
    out_dtype = states.dtype

    TB, Bp = _choose_batch_tile(B, block_batch)
    grid = (Bp // TB,)

    # Single fused cast + pad + transpose copy per input (no concat pass).
    def to_lane_dense(x):
        x = x.astype(compute_dtype)
        if Bp != B:
            x = jnp.pad(x, ((0, Bp - B), (0, 0)))
        return x.T                                              # (feat, Bp)

    xs_t = to_lane_dense(states)                                # (S, Bp)
    xa_t = to_lane_dense(actions)                               # (A, Bp)

    # Trace-time weight prep (free): split W1, cast MXU weights, keep biases f32.
    w1s = w1[:, :S].astype(compute_dtype)                       # (H1, S)
    w1a = w1[:, S:].astype(compute_dtype)                       # (H1, A)
    w2c = w2.astype(compute_dtype)                              # (H2, H1)
    b1f = b1.astype(jnp.float32)                                # (H1, 1)
    b2f = b2.astype(jnp.float32)                                # (H2, 1)
    b3f = b3.astype(jnp.float32)                                # (O, 1)

    use_vpu_head = (O == 1)
    if use_vpu_head:
        w3k = w3.astype(jnp.float32).T                          # (H2, 1), VPU operand
    else:
        w3k = w3.astype(compute_dtype)                          # (O, H2), MXU operand

    # Activation/output stream: batch-blocked along the lane axis.
    xs_spec = pl.BlockSpec((S, TB), lambda i: (0, i))
    xa_spec = pl.BlockSpec((A, TB), lambda i: (0, i))
    o_spec = pl.BlockSpec((O, TB), lambda i: (0, i))

    # Weights/biases: constant block index -> resident in VMEM across steps.
    def resident(arr):
        return pl.BlockSpec(arr.shape, lambda i: (0, 0))

    flops = 2 * Bp * ((S + A) * H1 + H1 * H2 + H2 * O)
    weight_bytes = sum(int(p.size) * p.dtype.itemsize
                       for p in (w1s, w1a, b1f, w2c, b2f, w3k, b3f))
    bytes_accessed = ((int(xs_t.size) + int(xa_t.size)) * xs_t.dtype.itemsize
                      + Bp * O * jnp.dtype(out_dtype).itemsize + weight_bytes)

    qt = pl.pallas_call(
        _make_kernel(use_vpu_head),
        out_shape=jax.ShapeDtypeStruct((O, Bp), out_dtype),
        grid=grid,
        in_specs=[
            xs_spec, xa_spec,
            resident(w1s), resident(w1a), resident(b1f),
            resident(w2c), resident(b2f),
            resident(w3k), resident(b3f),
        ],
        out_specs=o_spec,
        compiler_params=pltpu.CompilerParams(
            dimension_semantics=("parallel",)),
        cost_estimate=pl.CostEstimate(
            flops=flops, transcendentals=0, bytes_accessed=bytes_accessed),
    )(xs_t, xa_t, w1s, w1a, b1f, w2c, b2f, w3k, b3f)

    return qt[:, :B].T                                          # (B, O)


def init_linear(key, fan_in, fan_out):
    """torch.nn.Linear default init (uniform +/- 1/sqrt(fan_in)).
    Weight kept in PyTorch (out, in) layout; bias as an (out, 1) column."""
    kw, kb = jax.random.split(key)
    bound = 1.0 / jnp.sqrt(jnp.float32(fan_in))
    w = jax.random.uniform(kw, (fan_out, fan_in), jnp.float32, -bound, bound)
    b = jax.random.uniform(kb, (fan_out, 1), jnp.float32, -bound, bound)
    return w, b


def reference_forward(states, actions, params):
    """Plain-JAX reference matching the PyTorch forward semantics."""
    w1, b1, w2, b2, w3, b3 = params
    x = jnp.concatenate([states, actions], axis=1)
    h1 = jnp.maximum(x @ w1.T + b1[:, 0], 0.0)
    h2 = jnp.maximum(h1 @ w2.T + b2[:, 0], 0.0)
    return h2 @ w3.T + b3[:, 0]


if __name__ == "__main__":
    B, S, A = 8, 12, 4        # batch, state_dim, action_dim
    H1, H2, O = 32, 32, 1     # hidden sizes, Q output

    root = jax.random.PRNGKey(0)
    k_s, k_a, k1, k2, k3 = jax.random.split(root, 5)

    states = jax.random.normal(k_s, (B, S), jnp.float32)
    actions = jax.random.normal(k_a, (B, A), jnp.float32)

    w1, b1 = init_linear(k1, S + A, H1)   # layer 1 acts on the concatenated input
    w2, b2 = init_linear(k2, H1, H2)
    w3, b3 = init_linear(k3, H2, O)
    params = (w1, b1, w2, b2, w3, b3)

    q_ref = reference_forward(states, actions, params)

    # Exact-path check (f32 compute).
    q32 = jax.block_until_ready(
        contqnet_forward(states, actions, params, compute_dtype=jnp.float32))
    assert q32.shape == (B, O)
    assert jnp.allclose(q32, q_ref, atol=1e-5, rtol=1e-5)

    # Default fast path (bf16 activations/weights, f32 accumulation).
    qbf = jax.block_until_ready(contqnet_forward(states, actions, params))
    assert qbf.shape == (B, O)
    assert bool(jnp.all(jnp.isfinite(qbf)))
    assert jnp.allclose(qbf, q_ref, atol=5e-2, rtol=5e-2)

    print("KERNEL_OK")
</pallas_src>

<mosaic_0001>
module attributes {stable_mosaic.version = 11 : i64} {
  func.func @kernel(%arg0: i32, %arg1: memref<12x128xf32, #tpu.memory_space<vmem>>, %arg2: memref<4x128xf32, #tpu.memory_space<vmem>>, %arg3: memref<32x12xf32, #tpu.memory_space<vmem>>, %arg4: memref<32x4xf32, #tpu.memory_space<vmem>>, %arg5: memref<32x1xf32, #tpu.memory_space<vmem>>, %arg6: memref<32x32xf32, #tpu.memory_space<vmem>>, %arg7: memref<32x1xf32, #tpu.memory_space<vmem>>, %arg8: memref<32x1xf32, #tpu.memory_space<vmem>>, %arg9: memref<1x1xf32, #tpu.memory_space<vmem>>, %arg10: memref<1x128xf32, #tpu.memory_space<vmem>>) attributes {dimension_semantics = [#tpu.dimension_semantics<parallel>], iteration_bounds = array<i64: 1>, scalar_prefetch = 0 : i64, scratch_operands = 0 : i64, tpu.core_type = #tpu.core_type<tc>, window_params = [{transform_indices = @transform_0, window_bounds = array<i64: 12, 128>}, {transform_indices = @transform_1, window_bounds = array<i64: 4, 128>}, {pipeline_mode = #tpu.pipeline_mode<synchronous>, transform_indices = @transform_2, window_bounds = array<i64: 32, 12>}, {pipeline_mode = #tpu.pipeline_mode<synchronous>, transform_indices = @transform_3, window_bounds = array<i64: 32, 4>}, {pipeline_mode = #tpu.pipeline_mode<synchronous>, transform_indices = @transform_4, window_bounds = array<i64: 32, 1>}, {pipeline_mode = #tpu.pipeline_mode<synchronous>, transform_indices = @transform_5, window_bounds = array<i64: 32, 32>}, {pipeline_mode = #tpu.pipeline_mode<synchronous>, transform_indices = @transform_6, window_bounds = array<i64: 32, 1>}, {pipeline_mode = #tpu.pipeline_mode<synchronous>, transform_indices = @transform_7, window_bounds = array<i64: 32, 1>}, {pipeline_mode = #tpu.pipeline_mode<synchronous>, transform_indices = @transform_8, window_bounds = array<i64: 1, 1>}, {transform_indices = @transform_9, window_bounds = array<i64: 1, 128>}]} {
    %c0 = arith.constant 0 : index
    %c0_0 = arith.constant 0 : index
    %0 = vector.load %arg3[%c0, %c0_0] : memref<32x12xf32, #tpu.memory_space<vmem>>, vector<32x12xf32>
    %c0_1 = arith.constant 0 : index
    %c0_2 = arith.constant 0 : index
    %1 = vector.load %arg1[%c0_1, %c0_2] : memref<12x128xf32, #tpu.memory_space<vmem>>, vector<12x128xf32>
    %cst = arith.constant dense<0.000000e+00> : vector<32x128xf32>
    %2 = tpu.matmul %0, %1, %cst {dimension_numbers = #tpu.dot_dimension_numbers<[1], [0], [0], [1], [0, 0, 1, 1], [], []>} : vector<32x12xf32>, vector<12x128xf32>, vector<32x128xf32> -> vector<32x128xf32>
    %c0_3 = arith.constant 0 : index
    %c0_4 = arith.constant 0 : index
    %3 = vector.load %arg4[%c0_3, %c0_4] : memref<32x4xf32, #tpu.memory_space<vmem>>, vector<32x4xf32>
    %c0_5 = arith.constant 0 : index
    %c0_6 = arith.constant 0 : index
    %4 = vector.load %arg2[%c0_5, %c0_6] : memref<4x128xf32, #tpu.memory_space<vmem>>, vector<4x128xf32>
    %cst_7 = arith.constant dense<0.000000e+00> : vector<32x128xf32>
    %5 = tpu.matmul %3, %4, %cst_7 {dimension_numbers = #tpu.dot_dimension_numbers<[1], [0], [0], [1], [0, 0, 1, 1], [], []>} : vector<32x4xf32>, vector<4x128xf32>, vector<32x128xf32> -> vector<32x128xf32>
    %6 = arith.addf %2, %5 : vector<32x128xf32>
    %c0_8 = arith.constant 0 : index
    %c0_9 = arith.constant 0 : index
    %7 = vector.load %arg5[%c0_8, %c0_9] : memref<32x1xf32, #tpu.memory_space<vmem>>, vector<32x1xf32>
    %8 = vector.broadcast %7 : vector<32x1xf32> to vector<32x128xf32>
    %9 = arith.addf %6, %8 : vector<32x128xf32>
    %cst_10 = arith.constant 0.000000e+00 : f32
    %10 = vector.broadcast %cst_10 : f32 to vector<32x128xf32>
    %11 = arith.maximumf %9, %10 : vector<32x128xf32>
    %c0_11 = arith.constant 0 : index
    %c0_12 = arith.constant 0 : index
    %12 = vector.load %arg6[%c0_11, %c0_12] : memref<32x32xf32, #tpu.memory_space<vmem>>, vector<32x32xf32>
    %cst_13 = arith.constant dense<0.000000e+00> : vector<32x128xf32>
    %13 = tpu.matmul %12, %11, %cst_13 {dimension_numbers = #tpu.dot_dimension_numbers<[1], [0], [0], [1], [0, 0, 1, 1], [], []>} : vector<32x32xf32>, vector<32x128xf32>, vector<32x128xf32> -> vector<32x128xf32>
    %c0_14 = arith.constant 0 : index
    %c0_15 = arith.constant 0 : index
    %14 = vector.load %arg7[%c0_14, %c0_15] : memref<32x1xf32, #tpu.memory_space<vmem>>, vector<32x1xf32>
    %15 = vector.broadcast %14 : vector<32x1xf32> to vector<32x128xf32>
    %16 = arith.addf %13, %15 : vector<32x128xf32>
    %cst_16 = arith.constant 0.000000e+00 : f32
    %17 = vector.broadcast %cst_16 : f32 to vector<32x128xf32>
    %18 = arith.maximumf %16, %17 : vector<32x128xf32>
    %c0_17 = arith.constant 0 : index
    %c0_18 = arith.constant 0 : index
    %19 = vector.load %arg8[%c0_17, %c0_18] : memref<32x1xf32, #tpu.memory_space<vmem>>, vector<32x1xf32>
    %20 = vector.broadcast %19 : vector<32x1xf32> to vector<32x128xf32>
    %21 = arith.mulf %18, %20 : vector<32x128xf32>
    %cst_19 = arith.constant dense<0.000000e+00> : vector<128xf32>
    %22 = vector.multi_reduction <add>, %21, %cst_19 [0] : vector<32x128xf32> to vector<128xf32>
    %23 = vector.shape_cast %22 : vector<128xf32> to vector<1x128xf32>
    %c0_20 = arith.constant 0 : index
    %c0_21 = arith.constant 0 : index
    %24 = vector.load %arg9[%c0_20, %c0_21] : memref<1x1xf32, #tpu.memory_space<vmem>>, vector<1x1xf32>
    %25 = vector.broadcast %24 : vector<1x1xf32> to vector<1x128xf32>
    %26 = arith.addf %23, %25 : vector<1x128xf32>
    %c0_22 = arith.constant 0 : index
    %c0_23 = arith.constant 0 : index
    %27 = vector.load %arg10[%c0_22, %c0_23] : memref<1x128xf32, #tpu.memory_space<vmem>>, vector<1x128xf32>
    tpu.vector_store %arg10[%c0_22, %c0_23], %26 {strides = array<i32>} : memref<1x128xf32, #tpu.memory_space<vmem>>, vector<1x128xf32>,
    return
  }
  func.func @transform_0(%arg0: i32) -> (i32, i32) {
    %c0_i32 = arith.constant 0 : i32
    %c0_i32_0 = arith.constant 0 : i32
    return %c0_i32, %arg0 : i32, i32
  }
  func.func @transform_1(%arg0: i32) -> (i32, i32) {
    %c0_i32 = arith.constant 0 : i32
    %c0_i32_0 = arith.constant 0 : i32
    return %c0_i32, %arg0 : i32, i32
  }
  func.func @transform_2(%arg0: i32) -> (i32, i32) {
    %c0_i32 = arith.constant 0 : i32
    %c0_i32_0 = arith.constant 0 : i32
    %c0_i32_1 = arith.constant 0 : i32
    return %c0_i32, %c0_i32_0 : i32, i32
  }
  func.func @transform_3(%arg0: i32) -> (i32, i32) {
    %c0_i32 = arith.constant 0 : i32
    %c0_i32_0 = arith.constant 0 : i32
    %c0_i32_1 = arith.constant 0 : i32
    return %c0_i32, %c0_i32_0 : i32, i32
  }
  func.func @transform_4(%arg0: i32) -> (i32, i32) {
    %c0_i32 = arith.constant 0 : i32
    %c0_i32_0 = arith.constant 0 : i32
    %c0_i32_1 = arith.constant 0 : i32
    return %c0_i32, %c0_i32_0 : i32, i32
  }
  func.func @transform_5(%arg0: i32) -> (i32, i32) {
    %c0_i32 = arith.constant 0 : i32
    %c0_i32_0 = arith.constant 0 : i32
    %c0_i32_1 = arith.constant 0 : i32
    return %c0_i32, %c0_i32_0 : i32, i32
  }
  func.func @transform_6(%arg0: i32) -> (i32, i32) {
    %c0_i32 = arith.constant 0 : i32
    %c0_i32_0 = arith.constant 0 : i32
    %c0_i32_1 = arith.constant 0 : i32
    return %c0_i32, %c0_i32_0 : i32, i32
  }
  func.func @transform_7(%arg0: i32) -> (i32, i32) {
    %c0_i32 = arith.constant 0 : i32
    %c0_i32_0 = arith.constant 0 : i32
    %c0_i32_1 = arith.constant 0 : i32
    return %c0_i32, %c0_i32_0 : i32, i32
  }
  func.func @transform_8(%arg0: i32) -> (i32, i32) {
    %c0_i32 = arith.constant 0 : i32
    %c0_i32_0 = arith.constant 0 : i32
    %c0_i32_1 = arith.constant 0 : i32
    return %c0_i32, %c0_i32_0 : i32, i32
  }
  func.func @transform_9(%arg0: i32) -> (i32, i32) {
    %c0_i32 = arith.constant 0 : i32
    %c0_i32_0 = arith.constant 0 : i32
    return %c0_i32, %arg0 : i32, i32
  }
}

</mosaic_0001>

<bundles_post_ra>
// kernel: contqnet_forward.1
= control target key start
LH: loop header
LB: loop body
LE: loop exit
PB: predicated region body
PF: predicated region fallthrough
CT: control target
= control target key end

     0   :  { %vm58_vm0 = vcmask 1043456   ;;  %vm45_vm1 = vcmask 31744   ;;  %vm550_vm2 = vmmov 1   ;;  %v551_v9 = vmov 0   ;;  %s712_s1 = inlined_call_operand.vmem [shape: f32[4,128], index: 1, kind: input, shape index: {}]   ;;  %s713_s3 = inlined_call_operand.vmem [shape: f32[32,4], index: 3, kind: input, shape index: {}]   ;;  %s714_s0 = inlined_call_operand.vmem [shape: f32[12,128], index: 0, kind: input, shape index: {}]   ;;  %s715_s8 = inlined_call_operand.<no memory space> [shape: f32[1,1], index: 8, kind: input, shape index: {}]   ;;  %s716_s4 = inlined_call_operand.vmem [shape: f32[32,1], index: 4, kind: input, shape index: {}]   ;;  %s717_s2 = inlined_call_operand.vmem [shape: f32[32,12], index: 2, kind: input, shape index: {}]   ;;  %s718_s6 = inlined_call_operand.vmem [shape: f32[32,1], index: 6, kind: input, shape index: {}]   ;;  %s719_s7 = inlined_call_operand.vmem [shape: f32[32,1], index: 7, kind: input, shape index: {}]   ;;  %s720_s5 = inlined_call_operand.vmem [shape: f32[32,32], index: 5, kind: input, shape index: {}]   ;;  %s721_s9 = inlined_call_operand.vmem [shape: f32[1,128], index: 9, kind: output, shape index: {}]  }
   0x1   :  { %v44_v0 = vld [vmem:[%s712_s1] sm:$0xf]  ;;  %v41_v2 = vld [vmem:[%s713_s3 + $0x8] sm:$0xff]  ;;  %v14_v3 = vstv %s715_s8  ;;  %vm623_vm3 = vmpackc.low %vm58_vm0, %vm550_vm2  ;;  %548 = vset.pattern.permute.xlu0 %v551_v9  ;;  %549 = vset.pattern.permute.xlu1 %v551_v9  ;;  %vm147_vm4 = vcmask 97280   ;;  %vm308_vm5 = vcmask 261120  }
   0x2   :  { %v40_v1 = vld [vmem:[%s713_s3] sm:$0xff]  ;;  %496 = vmatprep.subr.msk.mxu0 %vm58_vm0, %v44_v0  ;;  %v39_v5 = vld [vmem:[%s714_s0 + $0x8] sm:$0xf]  ;;  %15 = vst [vmem:[#allocation2] sm:$0x1] %v14_v3  ;;  %v42_v8 = vld [vmem:[%s713_s3 + $0x10] sm:$0xff] }
   0x3   :  { %498 = vmatprep.mubr.msk.f32.mxu0 %vm45_vm1, %v40_v1  ;;  %v38_v4 = vld [vmem:[%s714_s0] sm:$0xff]  ;;  %497 = vmatpush3.msk.msra.mxu0 %vm58_vm0, %v44_v0  ;;  %v43_v10 = vld [vmem:[%s713_s3 + $0x18] sm:$0xff]  ;;  %v250_v12 = vld [vmem:[%s716_s4 + $0x10] sm:$0xff] }
   0x4   :  { %v528_v7 = vpack.c.bf16 %v39_v5, %v38_v4  ;;  %499 = vmatmul.mubr.msk.f32.vlgmr.msra.gmra.mrb[0].mxu0 %vm45_vm1, %v41_v2  ;;  %v248_v11 = vld [vmem:[%s716_s4] sm:$0xff]  ;;  %v249_v14 = vld [vmem:[%s716_s4 + $0x8] sm:$0xff]  ;;  %264 = vperm.xlu1 %549, %v250_v12   ;;  %v251_v15 = vld [vmem:[%s716_s4 + $0x18] sm:$0xff]  ;;  %v453_v12 = vlaneseq }
   0x5   :  { %501 = vmatprep.mubr.msk.f32.mxu0 %vm45_vm1, %v42_v8  ;;  %v34_v13 = vld [vmem:[%s717_s2] sm:$0xff]  ;;  %254 = vperm.xlu0 %548, %v248_v11   ;;  %v35_v16 = vld [vmem:[%s717_s2 + $0x8] sm:$0xff]  ;;  %v36_v17 = vld [vmem:[%s717_s2 + $0x10] sm:$0xff] }
   0x6   :  { %530 = vmatprep.subr.msk.bf16.mxu0 %vm623_vm3, %v528_v7  ;;  %v284_v18 = vld [vmem:[%s718_s6] sm:$0xff]  ;;  %v285_v19 = vld [vmem:[%s718_s6 + $0x8] sm:$0xff]  ;;  %v37_v20 = vld [vmem:[%s717_s2 + $0x18] sm:$0xff] }
   0x7   :  { %533 = vmatpush3.bf16.msk.msra.mxu0 %vm623_vm3, %v528_v7  ;;  %v286_v21 = vld [vmem:[%s718_s6 + $0x10] sm:$0xff]  ;;  %v287_v22 = vld [vmem:[%s718_s6 + $0x18] sm:$0xff]  ;;  %v410_v23 = vld [vmem:[%s719_s7] sm:$0xff] }
   0x8   :  { %502 = vmatmul.mubr.msk.f32.gmra.mrb[2].mxu0 %vm45_vm1, %v43_v10  ;;  %269 = vperm.xlu1 %549, %v251_v15   ;;  %v411_v24 = vld [vmem:[%s719_s7 + $0x8] sm:$0xff]  ;;  %v412_v25 = vld [vmem:[%s719_s7 + $0x10] sm:$0xff]  ;;  %v413_v26 = vld [vmem:[%s719_s7 + $0x18] sm:$0xff]  ;;  %v454_v15 = vshrl.u32 %v453_v12, 7 }
   0x9   :  { %508 = vmatprep.mubr.msk.f32.mxu0 %vm147_vm4, %v34_v13  ;;  %259 = vperm.xlu0 %548, %v249_v14   ;;  %v447_v27 = vld [vmem:[#allocation2] sm:$0x1]  ;;  %v281_v47 = vld [vmem:[%s720_s5 + $0x8] sm:$0xff]  ;;  %v282_v48 = vld [vmem:[%s720_s5 + $0x10] sm:$0xff] }
   0xa   :  { %v280_v28 = vld [vmem:[%s720_s5] sm:$0xff]  ;;  %v283_v49 = vld [vmem:[%s720_s5 + $0x18] sm:$0xff] }
   0xb   :  { %522 = vmatprep.mubr.msk.f32.mxu1 %vm308_vm5, %v280_v28 }
   0xc   :  { %509 = vmatmul.mubr.msk.f32.vlgmr.msra.gmra.mrb[0].mxu0 %vm147_vm4, %v35_v16  ;;  %295 = vperm.xlu1 %549, %v285_v19  }
   0xd   :  { %511 = vmatprep.mubr.msk.f32.mxu0 %vm147_vm4, %v36_v17  ;;  %290 = vperm.xlu0 %548, %v284_v18   ;;  %v455_v18 = vsub.s32 0, %v454_v15 }
  0x10   :  { %512 = vmatmul.mubr.msk.f32.gmra.mrb[2].mxu0 %vm147_vm4, %v37_v20  ;;  %305 = vperm.xlu1 %549, %v287_v22  }
  0x11   :  { %300 = vperm.xlu0 %548, %v286_v21  }
  0x14   :  { %421 = vperm.xlu1 %549, %v411_v24  }
  0x15   :  { %416 = vperm.xlu0 %548, %v410_v23  }
  0x18   :  { %431 = vperm.xlu1 %549, %v413_v26  }
  0x19   :  { %426 = vperm.xlu0 %548, %v412_v25  }
  0x1d   :  { %450 = vperm.xlu0 %548, %v447_v27  }
  0x83   :  { %v265_v30 = vpop.permute.xlu1 %264 }
  0x84   :  { %v255_v29 = vpop.permute.xlu0 %254 }
  0x87   :  { %v270_v37 = vpop.permute.xlu1 %269 }
  0x88   :  { %v260_v31 = vpop.permute.xlu0 %259 }
  0x8b   :  { %v296_v51 = vpop.permute.xlu1 %295 }
  0x8c   :  { %v291_v50 = vpop.permute.xlu0 %290 }
  0x8f   :  { %v306_v53 = vpop.permute.xlu1 %305 }
  0x90   :  { %v301_v52 = vpop.permute.xlu0 %300 }
  0x93   :  { %v422_v60 = vpop.permute.xlu1 %421 }
  0x94   :  { %v417_v58 = vpop.permute.xlu0 %416 }
  0x97   :  { %v432_v9 = vpop.permute.xlu1 %431 }
  0x98   :  { %v427_v7 = vpop.permute.xlu0 %426 }
  0x9c   :  { %v451_v20 = vpop.permute.xlu0 %450 }
  0x9d   :  { %v456_v22 = vrot.slane %v451_v20, %v455_v18 }
  0xdf   :  { %v510_v32 = vpop.f32.mrb[0].mxu0 }
  0xe0   :  { %v273_v33 = vadd.f32 %v510_v32, %v260_v31  ;;  %v229_v34 = vpop.f32.mrb[1].mxu0 }
  0xe1   :  { %v272_v35 = vadd.f32 %v255_v29, %v229_v34 }
  0xe2   :  { %v277_v36 = vmax.f32 %v273_v33, 0.0 }
  0xe3   :  { %v276_v38 = vmax.f32 %v272_v35, 0.0  ;;  %v513_v39 = vpop.f32.mrb[2].mxu0 }
  0xe4   :  { %v275_v40 = vadd.f32 %v513_v39, %v270_v37  ;;  %v239_v41 = vpop.f32.mrb[3].mxu0 }
  0xe5   :  { %v274_v42 = vadd.f32 %v265_v30, %v239_v41  ;;  %v534_v43 = vpack.c.bf16 %v277_v36, %v276_v38 }
  0xe6   :  { %v279_v44 = vmax.f32 %v275_v40, 0.0 }
  0xe7   :  { %v278_v45 = vmax.f32 %v274_v42, 0.0  ;;  %535 = vmatprep.subr.bf16.mxu1 %v534_v43 }
  0xe8   :  { %537 = vmatpush3.bf16.msra.mxu1 %v534_v43 }
  0xe9   :  { %v538_v46 = vpack.c.bf16 %v279_v44, %v278_v45 }
  0xeb   :  { %539 = vmatprep.subr.bf16.mxu1 %v538_v46 }
  0xec   :  { %541 = vmatpush3.bf16.msra.mxu1 %v538_v46 }
  0xef   :  { %523 = vmatmul.mubr.msk.f32.vlgmr.msra.gmra.mrb[0].mxu1 %vm308_vm5, %v281_v47 }
  0xf0   :  { %525 = vmatprep.mubr.msk.f32.mxu1 %vm308_vm5, %v282_v48 }
  0xf3   :  { %526 = vmatmul.mubr.msk.f32.gmra.mrb[2].mxu1 %vm308_vm5, %v283_v49 }
 0x1c2   :  { %v524_v54 = vpop.f32.mrb[0].mxu1 }
 0x1c3   :  { %v393_v55 = vadd.f32 %v524_v54, %v296_v51  ;;  %v387_v56 = vpop.f32.mrb[1].mxu1 }
 0x1c4   :  { %v388_v57 = vadd.f32 %v387_v56, %v291_v50 }
 0x1c5   :  { %v407_v59 = vmax.f32 %v393_v55, 0.0 }
 0x1c6   :  { %v406_v61 = vmax.f32 %v388_v57, 0.0  ;;  %v527_v62 = vpop.f32.mrb[2].mxu1 }
 0x1c7   :  { %v435_v63 = vmul.f32 %v422_v60, %v407_v59  ;;  %v403_v0 = vadd.f32 %v527_v62, %v306_v53  ;;  %v397_v1 = vpop.f32.mrb[3].mxu1 }
 0x1c8   :  { %v434_v2 = vmul.f32 %v417_v58, %v406_v61  ;;  %v398_v3 = vadd.f32 %v397_v1, %v301_v52 }
 0x1c9   :  { %v409_v5 = vmax.f32 %v403_v0, 0.0 }
 0x1ca   :  { %v438_v4 = vadd.f32 %v435_v63, %v434_v2  ;;  %v408_v6 = vmax.f32 %v398_v3, 0.0 }
 0x1cb   :  { %v437_v10 = vmul.f32 %v432_v9, %v409_v5 }
 0x1cc   :  { %v436_v8 = vmul.f32 %v427_v7, %v408_v6 }
 0x1ce   :  { %v439_v11 = vadd.f32 %v438_v4, %v436_v8 }
 0x1d0   :  { %v440_v13 = vadd.f32 %v439_v11, %v437_v10 }
 0x1d2   :  { %v441_v14 = vrot.slane %v440_v13, 4 }
 0x1d4   :  { %v442_v16 = vadd.f32 %v441_v14, %v440_v13 }
 0x1d6   :  { %v443_v17 = vrot.slane %v442_v16, 2 }
 0x1d8   :  { %v444_v19 = vadd.f32 %v443_v17, %v442_v16 }
 0x1da   :  { %v445_v21 = vrot.slane %v444_v19, 1 }
 0x1dc   :  { %v446_v23 = vadd.f32 %v445_v21, %v444_v19 }
 0x1de   :  { %v457_v24 = vadd.f32 %v456_v22, %v446_v23 }
 0x1e0   :  { %458 = vst [vmem:[%s721_s9] sm:$0x1] %v457_v24 }

</bundles_post_ra>
